<compile_context>
chip_gen: v5e
topology: v5e:2x2
jax: 0.10.0
libtpu: 0.0.40
codegen_flags: <defaults>
</compile_context>

<pallas_src>
import functools

import numpy as np

import jax
import jax.numpy as jnp
from jax import lax
from jax.experimental import pallas as pl
from jax.experimental.pallas import tpu as pltpu


_SUBLANE_TILE = {1: 32, 2: 16, 4: 8}


def _focal_term(pt, gamma):
    """(1 - pt) ** gamma, matching torch.pow semantics."""
    one_minus = 1.0 - pt
    g = float(gamma)
    if g == int(g) and 0 <= int(g) <= 8:
        ig = int(g)
        if ig == 0:
            return jnp.ones_like(pt)
        out = one_minus
        for _ in range(ig - 1):
            out = out * one_minus
        return out
    # TODO(synk): non-integer gamma can yield NaN when smoothing pushes pt > 1
    # (negative base to a fractional power); this matches torch.pow behavior.
    return jnp.power(one_minus, g)


def _focal_dense_kernel(logit_ref, target_ref, out_ref, *, num_class, gamma,
                        smooth, alpha, uniform_alpha, hw, t_s, needs_mask):
    """Dense layout: logit_ref (C, t_s, 128), target_ref (t_s, 128) -> (1,1)."""
    idx = target_ref[...].astype(jnp.int32)                    # (t_s, 128)
    # TODO(synk): 225 is the reference's hard-coded ignore-label rewrite; the
    # rewritten pixels still contribute to the loss/mean, exactly like PyTorch.
    idx = jnp.where(idx == 225, 0, idx)

    lo = smooth / (num_class - 1)
    hi = 1.0 - smooth
    pt = jnp.zeros((t_s, 128), jnp.float32)
    a_row = None if uniform_alpha else jnp.zeros((t_s, 128), jnp.float32)
    for c in range(num_class):                 # unrolled; C is small on this path
        sel = idx == c
        pt = pt + jnp.where(sel, hi, lo) * logit_ref[c].astype(jnp.float32)
        if not uniform_alpha:
            a_row = a_row + jnp.where(sel, alpha[c], 0.0)
    pt = pt + smooth

    if needs_mask:
        row = lax.broadcasted_iota(jnp.int32, (t_s, 128), 0)
        lane = lax.broadcasted_iota(jnp.int32, (t_s, 128), 1)
        flat = (pl.program_id(1) * t_s + row) * 128 + lane
        pt = jnp.where(flat < hw, pt, 1.0)     # -> log(pt)=0 and (1-pt)^g=0

    fl = _focal_term(pt, gamma) * jnp.log(pt)
    if uniform_alpha:
        loss = (-alpha[0]) * fl
    else:
        loss = -a_row * fl
    out_ref[...] = jnp.sum(loss, keepdims=True)                # (1, 1) partial


def _focal_sublane_kernel(logit_ref, target_ref, alpha_ref, out_ref, *,
                          num_class, gamma, smooth, hw, t_hw, needs_mask):
    """Large-C fallback: logit_ref (C, t_hw), target_ref (1, t_hw) -> (1,1)."""
    logit = logit_ref[...].astype(jnp.float32)                 # (C, T)
    idx = target_ref[...].astype(jnp.int32)                    # (1, T)
    idx = jnp.where(idx == 225, 0, idx)

    cls = lax.broadcasted_iota(jnp.int32, (num_class, t_hw), 0)
    sel = cls == idx                                           # (C, T)
    one_hot = jnp.where(sel, 1.0 - smooth, smooth / (num_class - 1))
    pt = jnp.sum(one_hot * logit, axis=0, keepdims=True) + smooth      # (1, T)
    a_row = jnp.sum(jnp.where(sel, alpha_ref[...], 0.0), axis=0, keepdims=True)

    if needs_mask:
        lane = lax.broadcasted_iota(jnp.int32, (1, t_hw), 1)
        pt = jnp.where(pl.program_id(1) * t_hw + lane < hw, pt, 1.0)

    loss = -a_row * _focal_term(pt, gamma) * jnp.log(pt)
    out_ref[...] = jnp.sum(loss, keepdims=True)


def _tpu_budgets(max_tile_bytes, vmem_limit_bytes):
    """Generation-aware (tile_budget, vmem_limit) in bytes."""
    vmem_cap = 64 * 1024 * 1024                 # conservative default (v7x-sized)
    try:
        info = pltpu.get_tpu_info()
        vmem_cap = int(getattr(info, "vmem_capacity_bytes", vmem_cap))
    except Exception:
        pass
    if vmem_cap >= 96 * 1024 * 1024:
        # v5e / v6e: 128 MiB physical VMEM; large tiles amortize the ~0.35us
        # per-grid-step overhead against the slower HBM and still leave room.
        tile, limit = 12 * 1024 * 1024, 64 * 1024 * 1024
    else:
        # v7x: only 64 MiB physical VMEM (but ~2.3x HBM BW); keep the
        # double-buffered working set comfortably inside the physical limit.
        tile, limit = 8 * 1024 * 1024, 48 * 1024 * 1024
    if max_tile_bytes is not None:
        tile = int(max_tile_bytes)
    if vmem_limit_bytes is not None:
        limit = int(vmem_limit_bytes)
    return tile, limit


def _alpha_vector(alpha, num_class, balance_index):
    """Static alpha handling mirroring FocalLoss.__init__/forward."""
    if alpha is None:
        return np.ones((num_class,), np.float32)
    if isinstance(alpha, (list, tuple, np.ndarray)):
        a = np.asarray(alpha, np.float32).reshape(-1)
        assert a.shape[0] == num_class
        a = a / a.sum()
        return (1.0 / a).astype(np.float32)
    if isinstance(alpha, float):
        a = np.full((num_class,), 1.0 - alpha, np.float32)
        a[balance_index] = alpha
        return a
    raise TypeError("Not support alpha type")


def focal_loss(logit, target, *, alpha=None, gamma=2.0, balance_index=0,
               smooth=1e-5, size_average=True, max_tile_bytes=None,
               vmem_limit_bytes=None):
    """JAX/Pallas equivalent of FocalLoss.forward (apply_nonlin=None)."""
    if smooth is not None and (smooth < 0 or smooth > 1.0):
        raise ValueError("smooth value should be in [0,1]")
    smooth = 0.0 if smooth is None else float(smooth)

    num_class = int(logit.shape[1])
    alpha_np = _alpha_vector(alpha, num_class, balance_index)
    uniform_alpha = bool(np.all(alpha_np == alpha_np[0]))

    # --- native-layout flattening: NCHW -> (N, C, HW); no data movement ---
    if logit.ndim > 2:
        n_eff = int(logit.shape[0])
        hw = int(np.prod(logit.shape[2:]))
        logit3 = logit.reshape(n_eff, num_class, hw)
        target2 = target.reshape(n_eff, hw)
    else:
        n_eff = 1
        hw = int(logit.shape[0])
        logit3 = logit.T.reshape(1, num_class, hw)   # 2-D case: one small transpose
        target2 = target.reshape(1, hw)

    # Keep the target's native integer width (cast happens in-kernel); only
    # copy when the dtype is genuinely non-integer.
    if not jnp.issubdtype(target2.dtype, jnp.integer):
        target2 = target2.astype(jnp.int32)

    tile_budget, vmem_limit = _tpu_budgets(max_tile_bytes, vmem_limit_bytes)
    l_item = jnp.dtype(logit3.dtype).itemsize
    t_item = jnp.dtype(target2.dtype).itemsize

    if num_class <= 64:
        # ---- dense spatial layout: (N, C, S, 128) logits / (N, S, 128) targets ----
        s_total = pl.cdiv(hw, 128)
        pad = s_total * 128 - hw
        if pad:
            logit3 = jnp.pad(logit3, ((0, 0), (0, 0), (0, pad)))
            target2 = jnp.pad(target2, ((0, 0), (0, pad)))
        logit4 = logit3.reshape(n_eff, num_class, s_total, 128)
        target3 = target2.reshape(n_eff, s_total, 128)

        # Padding-corrected bytes per 128-lane row of one (logit + target) tile.
        bytes_per_row = num_class * 128 * l_item + 128 * t_item
        budget_rows = max(32, int(tile_budget // bytes_per_row))
        t_s = (budget_rows // 32) * 32            # mult. of 32 covers f32/bf16/int8
        if t_s >= s_total:
            t_s = s_total
            if n_eff == 1 and s_total >= 64:
                # v7x megacore: never leave the whole kernel on one TensorCore.
                t_s = ((pl.cdiv(s_total, 2) + 31) // 32) * 32
        grid_s = pl.cdiv(s_total, t_s)
        needs_mask = (pad != 0) or (s_total % t_s != 0)

        kernel = functools.partial(
            _focal_dense_kernel, num_class=num_class, gamma=float(gamma),
            smooth=smooth, alpha=tuple(float(a) for a in alpha_np),
            uniform_alpha=uniform_alpha, hw=hw, t_s=t_s, needs_mask=needs_mask)

        partials = pl.pallas_call(
            kernel,
            out_shape=jax.ShapeDtypeStruct((n_eff, grid_s, 1, 1), jnp.float32),
            grid_spec=pltpu.PrefetchScalarGridSpec(
                num_scalar_prefetch=0,
                grid=(n_eff, grid_s),
                in_specs=[
                    pl.BlockSpec((None, num_class, t_s, 128),
                                 lambda b, t: (b, 0, t, 0)),
                    pl.BlockSpec((None, t_s, 128), lambda b, t: (b, t, 0)),
                ],
                out_specs=pl.BlockSpec((None, None, 1, 1),
                                       lambda b, t: (b, t, 0, 0)),
            ),
            compiler_params=pltpu.CompilerParams(
                dimension_semantics=("parallel", "parallel"),
                vmem_limit_bytes=vmem_limit),
        )(logit4, target3)
        total = jnp.sum(partials)
    else:
        # ---- large-C fallback: classes on the sublane axis, HW on lanes ----
        subl = _SUBLANE_TILE.get(l_item, 8)
        c_pad = -(-num_class // subl) * subl
        # sublane-padded logit column + 8x-sublane-padded target column
        bytes_per_col = c_pad * l_item + 32
        budget_t = max(128, int(tile_budget // bytes_per_col))
        if budget_t >= hw:
            t_hw = hw
            if n_eff == 1 and hw >= 256:
                t_hw = ((pl.cdiv(hw, 2) + 127) // 128) * 128   # force >= 2 tiles
        else:
            t_hw = max(128, (budget_t // 128) * 128)
        grid_t = pl.cdiv(hw, t_hw)
        needs_mask = (hw % t_hw) != 0

        target3 = target2.reshape(n_eff, 1, hw)
        alpha_arr = jnp.asarray(alpha_np.reshape(num_class, 1))

        kernel = functools.partial(
            _focal_sublane_kernel, num_class=num_class, gamma=float(gamma),
            smooth=smooth, hw=hw, t_hw=t_hw, needs_mask=needs_mask)

        partials = pl.pallas_call(
            kernel,
            out_shape=jax.ShapeDtypeStruct((n_eff, grid_t, 1, 1), jnp.float32),
            grid_spec=pltpu.PrefetchScalarGridSpec(
                num_scalar_prefetch=0,
                grid=(n_eff, grid_t),
                in_specs=[
                    pl.BlockSpec((None, num_class, t_hw),
                                 lambda b, t: (b, 0, t)),
                    pl.BlockSpec((None, 1, t_hw), lambda b, t: (b, 0, t)),
                    pl.BlockSpec((num_class, 1), lambda b, t: (0, 0)),
                ],
                out_specs=pl.BlockSpec((None, None, 1, 1),
                                       lambda b, t: (b, t, 0, 0)),
            ),
            compiler_params=pltpu.CompilerParams(
                dimension_semantics=("parallel", "parallel"),
                vmem_limit_bytes=vmem_limit),
        )(logit3, target3, alpha_arr)
        total = jnp.sum(partials)

    m = n_eff * hw
    if size_average:
        return total / m
    return total


def _focal_loss_ref(logit, target, *, gamma=2.0, smooth=1e-5):
    """Plain-JAX reference (alpha=None path) for a correctness check."""
    c = logit.shape[1]
    l2 = jnp.transpose(
        logit.reshape(logit.shape[0], c, -1), (0, 2, 1)).reshape(-1, c)
    t = target.reshape(-1)
    t = jnp.where(t == 225, 0, t)
    oh = jax.nn.one_hot(t, c, dtype=jnp.float32)
    oh = jnp.clip(oh, smooth / (c - 1), 1.0 - smooth)
    pt = jnp.sum(oh * l2.astype(jnp.float32), axis=1) + smooth
    loss = -((1.0 - pt) ** gamma) * jnp.log(pt)
    return loss.mean()


if __name__ == "__main__":
    key = jax.random.PRNGKey(0)
    k1, k2 = jax.random.split(key)

    N, C, H, W = 2, 4, 16, 16
    # the module (with apply_nonlin=None) expects probabilities already
    raw = jax.random.normal(k1, (N, C, H, W), jnp.float32)
    logit = jax.nn.softmax(raw, axis=1)
    target = jax.random.randint(k2, (N, 1, H, W), 0, C, jnp.int32)

    out = focal_loss(logit, target, alpha=None, gamma=2.0, smooth=1e-5,
                     size_average=True)
    out = jax.block_until_ready(out)

    ref = _focal_loss_ref(logit, target, gamma=2.0, smooth=1e-5)
    assert jnp.allclose(out, ref, rtol=1e-5, atol=1e-5), (out, ref)

    print("KERNEL_OK")
</pallas_src>

<mosaic_0001>
module attributes {stable_mosaic.version = 11 : i64} {
  func.func @_focal_dense_kernel(%arg0: i32, %arg1: i32, %arg2: memref<1x4x2x128xf32, #tpu.memory_space<vmem>>, %arg3: memref<1x2x128xi32, #tpu.memory_space<vmem>>, %arg4: memref<1x1x1x1xf32, #tpu.memory_space<vmem>>) attributes {dimension_semantics = [#tpu.dimension_semantics<parallel>, #tpu.dimension_semantics<parallel>], iteration_bounds = array<i64: 2, 1>, scalar_prefetch = 0 : i64, scratch_operands = 0 : i64, tpu.core_type = #tpu.core_type<tc>, window_params = [{transform_indices = @transform_0, window_bounds = array<i64: 1, 4, 2, 128>}, {transform_indices = @transform_1, window_bounds = array<i64: 1, 2, 128>}, {transform_indices = @transform_2, window_bounds = array<i64: 1, 1, 1, 1>}]} {
    %c0 = arith.constant 0 : index
    %c0_0 = arith.constant 0 : index
    %c0_1 = arith.constant 0 : index
    %0 = vector.load %arg3[%c0, %c0_0, %c0_1] : memref<1x2x128xi32, #tpu.memory_space<vmem>>, vector<1x2x128xi32>
    %1 = vector.shape_cast %0 : vector<1x2x128xi32> to vector<2x128xi32>
    %c225_i32 = arith.constant 225 : i32
    %2 = vector.broadcast %c225_i32 : i32 to vector<2x128xi32>
    %3 = arith.cmpi eq, %1, %2 : vector<2x128xi32>
    %c0_i32 = arith.constant 0 : i32
    %4 = vector.broadcast %c0_i32 : i32 to vector<2x128xi32>
    %5 = arith.select %3, %4, %1 : vector<2x128xi1>, vector<2x128xi32>
    %cst = arith.constant 0.000000e+00 : f32
    %6 = vector.broadcast %cst : f32 to vector<2x128xf32>
    %c0_i32_2 = arith.constant 0 : i32
    %7 = vector.broadcast %c0_i32_2 : i32 to vector<2x128xi32>
    %8 = arith.cmpi eq, %5, %7 : vector<2x128xi32>
    %cst_3 = arith.constant 0.999989986 : f32
    %cst_4 = arith.constant 3.33333332E-6 : f32
    %9 = vector.broadcast %cst_3 : f32 to vector<2x128xf32>
    %10 = vector.broadcast %cst_4 : f32 to vector<2x128xf32>
    %11 = arith.select %8, %9, %10 : vector<2x128xi1>, vector<2x128xf32>
    %c0_5 = arith.constant 0 : index
    %c0_6 = arith.constant 0 : index
    %c0_7 = arith.constant 0 : index
    %c0_8 = arith.constant 0 : index
    %12 = vector.load %arg2[%c0_5, %c0_6, %c0_7, %c0_8] : memref<1x4x2x128xf32, #tpu.memory_space<vmem>>, vector<1x1x2x128xf32>
    %13 = vector.shape_cast %12 : vector<1x1x2x128xf32> to vector<2x128xf32>
    %14 = arith.mulf %11, %13 : vector<2x128xf32>
    %15 = arith.addf %6, %14 : vector<2x128xf32>
    %c1_i32 = arith.constant 1 : i32
    %16 = vector.broadcast %c1_i32 : i32 to vector<2x128xi32>
    %17 = arith.cmpi eq, %5, %16 : vector<2x128xi32>
    %cst_9 = arith.constant 0.999989986 : f32
    %cst_10 = arith.constant 3.33333332E-6 : f32
    %18 = vector.broadcast %cst_9 : f32 to vector<2x128xf32>
    %19 = vector.broadcast %cst_10 : f32 to vector<2x128xf32>
    %20 = arith.select %17, %18, %19 : vector<2x128xi1>, vector<2x128xf32>
    %c0_11 = arith.constant 0 : index
    %c1 = arith.constant 1 : index
    %c0_12 = arith.constant 0 : index
    %c0_13 = arith.constant 0 : index
    %21 = vector.load %arg2[%c0_11, %c1, %c0_12, %c0_13] : memref<1x4x2x128xf32, #tpu.memory_space<vmem>>, vector<1x1x2x128xf32>
    %22 = vector.shape_cast %21 : vector<1x1x2x128xf32> to vector<2x128xf32>
    %23 = arith.mulf %20, %22 : vector<2x128xf32>
    %24 = arith.addf %15, %23 : vector<2x128xf32>
    %c2_i32 = arith.constant 2 : i32
    %25 = vector.broadcast %c2_i32 : i32 to vector<2x128xi32>
    %26 = arith.cmpi eq, %5, %25 : vector<2x128xi32>
    %cst_14 = arith.constant 0.999989986 : f32
    %cst_15 = arith.constant 3.33333332E-6 : f32
    %27 = vector.broadcast %cst_14 : f32 to vector<2x128xf32>
    %28 = vector.broadcast %cst_15 : f32 to vector<2x128xf32>
    %29 = arith.select %26, %27, %28 : vector<2x128xi1>, vector<2x128xf32>
    %c0_16 = arith.constant 0 : index
    %c2 = arith.constant 2 : index
    %c0_17 = arith.constant 0 : index
    %c0_18 = arith.constant 0 : index
    %30 = vector.load %arg2[%c0_16, %c2, %c0_17, %c0_18] : memref<1x4x2x128xf32, #tpu.memory_space<vmem>>, vector<1x1x2x128xf32>
    %31 = vector.shape_cast %30 : vector<1x1x2x128xf32> to vector<2x128xf32>
    %32 = arith.mulf %29, %31 : vector<2x128xf32>
    %33 = arith.addf %24, %32 : vector<2x128xf32>
    %c3_i32 = arith.constant 3 : i32
    %34 = vector.broadcast %c3_i32 : i32 to vector<2x128xi32>
    %35 = arith.cmpi eq, %5, %34 : vector<2x128xi32>
    %cst_19 = arith.constant 0.999989986 : f32
    %cst_20 = arith.constant 3.33333332E-6 : f32
    %36 = vector.broadcast %cst_19 : f32 to vector<2x128xf32>
    %37 = vector.broadcast %cst_20 : f32 to vector<2x128xf32>
    %38 = arith.select %35, %36, %37 : vector<2x128xi1>, vector<2x128xf32>
    %c0_21 = arith.constant 0 : index
    %c3 = arith.constant 3 : index
    %c0_22 = arith.constant 0 : index
    %c0_23 = arith.constant 0 : index
    %39 = vector.load %arg2[%c0_21, %c3, %c0_22, %c0_23] : memref<1x4x2x128xf32, #tpu.memory_space<vmem>>, vector<1x1x2x128xf32>
    %40 = vector.shape_cast %39 : vector<1x1x2x128xf32> to vector<2x128xf32>
    %41 = arith.mulf %38, %40 : vector<2x128xf32>
    %42 = arith.addf %33, %41 : vector<2x128xf32>
    %cst_24 = arith.constant 9.99999974E-6 : f32
    %43 = vector.broadcast %cst_24 : f32 to vector<2x128xf32>
    %44 = arith.addf %42, %43 : vector<2x128xf32>
    %cst_25 = arith.constant 1.000000e+00 : f32
    %45 = vector.broadcast %cst_25 : f32 to vector<2x128xf32>
    %46 = arith.subf %45, %44 : vector<2x128xf32>
    %47 = arith.mulf %46, %46 : vector<2x128xf32>
    %48 = math.log %44 : vector<2x128xf32>
    %49 = arith.mulf %47, %48 : vector<2x128xf32>
    %cst_26 = arith.constant -1.000000e+00 : f32
    %50 = vector.broadcast %cst_26 : f32 to vector<2x128xf32>
    %51 = arith.mulf %50, %49 : vector<2x128xf32>
    %52 = vector.shape_cast %51 : vector<2x128xf32> to vector<1x2x128xf32>
    %cst_27 = arith.constant dense<0.000000e+00> : vector<1xf32>
    %53 = vector.multi_reduction <add>, %52, %cst_27 [1, 2] : vector<1x2x128xf32> to vector<1xf32>
    %54 = vector.shape_cast %53 : vector<1xf32> to vector<1x1x1xf32>
    %55 = vector.extract %54[0, 0, 0] : f32 from vector<1x1x1xf32>
    %56 = vector.broadcast %55 : f32 to vector<1x1xf32>
    %c0_28 = arith.constant 0 : index
    %c0_29 = arith.constant 0 : index
    %c0_30 = arith.constant 0 : index
    %c0_31 = arith.constant 0 : index
    %57 = vector.load %arg4[%c0_28, %c0_29, %c0_30, %c0_31] : memref<1x1x1x1xf32, #tpu.memory_space<vmem>>, vector<1x1x1x1xf32>
    %58 = vector.shape_cast %57 : vector<1x1x1x1xf32> to vector<1x1xf32>
    %59 = vector.shape_cast %56 : vector<1x1xf32> to vector<1x1x1x1xf32>
    tpu.vector_store %arg4[%c0_28, %c0_29, %c0_30, %c0_31], %59 {strides = array<i32>} : memref<1x1x1x1xf32, #tpu.memory_space<vmem>>, vector<1x1x1x1xf32>,
    return
  }
  func.func @transform_0(%arg0: i32, %arg1: i32) -> (i32, i32, i32, i32) {
    %c0_i32 = arith.constant 0 : i32
    %c0_i32_0 = arith.constant 0 : i32
    %c0_i32_1 = arith.constant 0 : i32
    return %arg0, %c0_i32, %arg1, %c0_i32_0 : i32, i32, i32, i32
  }
  func.func @transform_1(%arg0: i32, %arg1: i32) -> (i32, i32, i32) {
    %c0_i32 = arith.constant 0 : i32
    %c0_i32_0 = arith.constant 0 : i32
    return %arg0, %arg1, %c0_i32 : i32, i32, i32
  }
  func.func @transform_2(%arg0: i32, %arg1: i32) -> (i32, i32, i32, i32) {
    %c0_i32 = arith.constant 0 : i32
    %c0_i32_0 = arith.constant 0 : i32
    %c0_i32_1 = arith.constant 0 : i32
    return %arg0, %arg1, %c0_i32, %c0_i32_0 : i32, i32, i32, i32
  }
}

</mosaic_0001>

<bundles_post_ra>
// kernel: tpu_custom_call.1
= control target key start
LH: loop header
LB: loop body
LE: loop exit
PB: predicated region body
PF: predicated region fallthrough
CT: control target
= control target key end

     0   :  { %7 = vsyncpa [#allocation3], 0  ;;  %s700_s0 = inlined_call_operand.hbm [shape: f32[2,4,2,128], index: 0, kind: input, shape index: {}]   ;;  %s701_s1 = inlined_call_operand.hbm [shape: s32[2,2,128], index: 1, kind: input, shape index: {}]   ;;  %s702_s2 = inlined_call_operand.vmem [shape: f32[2,1,1,1], index: 2, kind: output, shape index: {}]  }
   0x1   :  { %9 = vsyncpa [#allocation3 + $0x1], 0 }
   0x2   :  { %10 = vsyncpa [#allocation5], 0 }
   0x3   :  { %12 = vsyncpa [#allocation5 + $0x1], 0  ;;  %s596_s9 = smov 0   ;;  %s598_s10 = smov 0  }
   0x4   :  { %s600_s11 = smov 0   ;;  %s602_s12 = smov 0  }
   0x5   :  { %s604_s13 = smov 0   ;;  %s606_s14 = smov 0  }
   0x6 LB: > { %s377_s15 = sadd.s32 4294967295, %s576_s14   ;;  %s30_s16 = sadd.s32 1, %s572_s13  ;;  %s576_s14 = sphi %s606_s14, %s18_s14   ;;  %s572_s13 = sphi %s604_s13, %s710_s13   ;;  %s568_s12 = sphi %s602_s12, %s709_s12   ;;  %s564_s11 = sphi %s600_s11, %s708_s11   ;;  %s560_s10 = sphi %s598_s10, %s707_s10   ;;  %s556_s9 = sphi %s596_s9, %s706_s9  }
   0x7   : > { %p32_p0 = scmp.ge.s32.totalorder %s30_s16, 2  ;;  %s39_s17 = sadd.s32 1, %s564_s11 }
   0x8   : > { %p46_p1 = scmp.ne.s32.totalorder %s564_s11, %s560_s10  ;;  %p47_p2 = scmp.eq.s32.totalorder %s576_s14, 0 }
   0x9   : > { %s712_s16 = smov (%p32_p0, %s30_s16), 0  ;;  %p52_p4 = scmp.ne.s32.totalorder %s560_s10, %s556_s9 }
   0xa   : > { %p632_p3 = por %p47_p2, %p46_p1  ;;  %s34_s19 = ssub.s32 %s572_s13, %s712_s16 }
   0xb   : > { %p53_p5 = scmp.eq.s32.totalorder %s377_s15, 0  ;;  %p37_p6 = scmp.eq.s32.totalorder %s34_s19, 0 }
   0xc   : > { %p408_p8 = scmp.lt.s32.totalorder %s576_s14, 2  ;;  %s132_s22 = sand.u32 1, %s564_s11  }
   0xd   : > { %p639_p7 = por %p53_p5, %p52_p4  ;;  %s394_s23 = sshll.u32 %s572_s13, 3 }
   0xe   : > { %s645_s21 = scalar_select %p37_p6, %s564_s11, %s39_s17  }
   0xf   : > { %s381_s24 = sshll.u32 %s132_s22, 3  ;;  %s142_s27 = scalar_lea.hbm %s700_s0, %s394_s23 }
  0x10   : > { %s143_s28 = sshll.u32 %s142_s27, 4  ;;  %s136_s29 = scalar_lea.vmem [#allocation2], %s381_s24  ;;  %s144_s28 = int_to_ptr.hbm [resolvable:$true] %s143_s28 }
  0x11   : > { %s145_s30 = sshll.u32 %s136_s29, 4  ;;  %p654_p9 = pnand %p408_p8, %p632_p3  ;;  %s146_s30 = int_to_ptr.vmem [resolvable:$true] %s145_s30 }
  0x12   : > { %p386_p10 = scmp.ge.s32.totalorder %s576_s14, 1  ;;  %p173_p11 = scmp.lt.s32.totalorder %s576_s14, 3 }
  0x13   : > { %s133_s4 = scalar_lea.sflag [#allocation3], %s132_s22  ;;  %s578_s5 = smov 32  }
  0x14   : > { %s579_s6 = smov 2   ;;  %p174_p12 = pnand %p386_p10, %p173_p11 }
  0x15   : > { %404 = dma.hbm_to_vmem [thread:$0]  (!%p654_p9), %s144_s28, 128, %s146_s30, %s133_s4, %s578_s5, %s578_s5, %s579_s6  }
  0x16   : > { %s384_s7 = sshll.u32 %s132_s22, 1  ;;  %s385_s8 = sshll.u32 %s572_s13, 1 }
  0x17   : > { %s164_s17 = scalar_lea.hbm %s701_s1, %s385_s8  ;;  %s159_s19 = scalar_lea.vmem [#allocation4], %s384_s7 }
  0x18   : > { %s166_s18 = sshll.u32 %s164_s17, 4  ;;  %s168_s23 = sshll.u32 %s159_s19, 4  ;;  %s167_s18 = int_to_ptr.hbm [resolvable:$true] %s166_s18  ;;  %s169_s23 = int_to_ptr.vmem [resolvable:$true] %s168_s23 }
  0x19   : > { %s156_s24 = scalar_lea.sflag [#allocation5], %s132_s22  ;;  %177 = sbr.rel (%p174_p12) target bundleno = 243 (0xf3), region = 28 }
  0x1a   : > { %407 = dma.hbm_to_vmem [thread:$0]  (!%p654_p9), %s167_s18, 32, %s169_s23, %s156_s24  }
  0x1b   : > { %s179_s25 = sand.u32 (!%p174_p12), 1, %s560_s10  }
  0x1c   : > { %s387_s26 = sshll.u32 (!%p174_p12), %s179_s25, 3  ;;  %s180_s27 = scalar_lea.sflag (!%p174_p12), [#allocation3], %s179_s25 }
  0x1d   : > { %s183_s28 = scalar_lea.vmem (!%p174_p12), [#allocation2], %s387_s26 }
  0x1e   : > { %547 = dma.done.wait (%p639_p7), %s180_s27, 128  }
  0x1f   : > { %549 = vsyncadd (%p639_p7), %s180_s27, 4294967168  ;;  %s388_s29 = sshll.u32 %s179_s25, 1  ;;  %s190_s30 = scalar_lea.sflag [#allocation5], %s179_s25 }
  0x20   : > { %s193_s4 = scalar_lea.vmem [#allocation4], %s388_s29 }
  0x21   : > { %551 = dma.done.wait (%p639_p7), %s190_s30, 32  }
  0x22   : > { %553 = vsyncadd (%p639_p7), %s190_s30, 4294967264  ;;  %v227_v0 = vld [vmem:[%s193_s4] sm:$0x3]  ;;  %v232_v1 = vld [vmem:[%s183_s28] sm:$0x3]  ;;  %vm260_vm5 = vcmask 1041408  }
  0x23   : > { %vm228_vm0 = vcmp.eq.s32.totalorder %v227_v0, 225  ;;  %v389_v3 = vld [vmem:[%s183_s28 + $0x2] sm:$0x3]  ;;  %v390_v4 = vld [vmem:[%s183_s28 + $0x4] sm:$0x3]  ;;  %p221_p13 = scmp.lt.s32.totalorder %s568_s12, 1 }
  0x24   : > { %v229_v2 = vsel %vm228_vm0, 0, %v227_v0  ;;  %v391_v5 = vld [vmem:[%s183_s28 + $0x6] sm:$0x3]  ;;  %v580_v6 = vmov 3.3333333e-06   ;;  %vm272_vm6 = vcmask 0  }
  0x25   : > { %vm230_vm1 = vcmp.eq.s32.totalorder %v229_v2, 0  ;;  %vm235_vm2 = vcmp.eq.s32.totalorder %v229_v2, 1  ;;  %vm241_vm3 = vcmp.eq.s32.totalorder %v229_v2, 2  ;;  %vm247_vm4 = vcmp.eq.s32.totalorder %v229_v2, 3  ;;  %s714_s12 = smov (!%p221_p13, %s568_s12), 1 }
  0x26   : > { %v231_v7 = vsel %vm230_vm1, 0.99999, %v580_v6  ;;  %v236_v8 = vsel %vm235_vm2, 0.99999, %v580_v6  ;;  %v242_v9 = vsel %vm241_vm3, 0.99999, %v580_v6  ;;  %s226_s3 = scalar_lea.vmem %s702_s2, %s714_s12 }
  0x27   : > { %v233_v10 = vmul.f32 %v232_v1, %v231_v7  ;;  %v239_v11 = vmul.f32 %v389_v3, %v236_v8  ;;  %v245_v12 = vmul.f32 %v390_v4, %v242_v9  ;;  %v248_v13 = vsel %vm247_vm4, 0.99999, %v580_v6 }
  0x28   : > { %v251_v15 = vmul.f32 %v391_v5, %v248_v13 }
  0x29   : > { %v240_v14 = vadd.f32 %v239_v11, %v233_v10 }
  0x2b   : > { %v246_v16 = vadd.f32 %v245_v12, %v240_v14 }
  0x2d   : > { %v252_v17 = vadd.f32 %v251_v15, %v246_v16 }
  0x2f   : > { %v253_v18 = vadd.f32 1e-05, %v252_v17 }
  0x31   : > { %460 = vlog2.f32 %v253_v18  ;;  %v254_v19 = vsub.f32 1.0, %v253_v18 }
  0x33   : > { %v255_v20 = vmul.f32 %v254_v19, %v254_v19 }
  0x37   : > { %v461_v21 = vpop.eup %460 }
  0x38   : > { %v257_v22 = vmul.f32 0.6931472, %v461_v21 }
  0x3a   : > { %v258_v23 = vmul.f32 %v257_v22, %v255_v20 }
  0x3c   : > { %v259_v24 = vmul.f32 -1.0, %v258_v23 }
  0x3e   : > { %v261_v25 = vsel %vm260_vm5, %v259_v24, 0.0 }
  0x3f   : > { %262 = vadd.xlane.f32.xlu0 %v261_v25 }
  0xb2   : > { %v263_v26 = vpop.xlane.xlu0 %262 }
  0xb3   : > { %v264_v27 = vrot.slane %v263_v26, 4 }
  0xb5   : > { %v265_v28 = vadd.f32 %v264_v27, %v263_v26 }
  0xb7   : > { %v266_v29 = vrot.slane %v265_v28, 2 }
  0xb9   : > { %v267_v30 = vadd.f32 %v266_v29, %v265_v28 }
  0xbb   : > { %v268_v31 = vrot.slane %v267_v30, 1 }
  0xbd   : > { %v269_v32 = vadd.f32 %v268_v31, %v267_v30 }
  0xbf   : > { %395 = vpush %v269_v32 }
  0xf0   : > { %s396_s5 = spop %395 }
  0xf1   : > { %v271_v33 = vstv %s396_s5 }
  0xf2   : > { %273 = vst.msk [vmem:[%s226_s3] sm:$0x1] %vm272_vm6, %v271_v33 }
  0xf3 PF: > { %s18_s14 = sadd.s32 1, %s576_s14   ;;  %s706_s9 = smov %s560_s10 }
  0xf4   : > { %p15_p0 = scmp.ge.s32.totalorder %s18_s14, 4   ;;  %s707_s10 = smov %s564_s11 }
  0xf5   : > { %s708_s11 = smov %s645_s21  ;;  %s709_s12 = smov %s572_s13 }
  0xf6   : > { %s710_s13 = smov %s712_s16  ;;  %17 = sbr.rel (!%p15_p0) target bundleno = 6 (0x6), region = 84 }
  0xfb   :  { %297 = vsyncpa [#allocation3], 1 }
  0xfc   :  { %299 = vsyncpa [#allocation3 + $0x1], 1 }
  0xfd   :  { %300 = vsyncpa [#allocation5], 1 }
  0xfe   :  { %302 = vsyncpa [#allocation5 + $0x1], 1 }

</bundles_post_ra>
